<compile_context>
chip_gen: v7x
topology: tpu7x:2x2x1
jax: 0.10.0
libtpu: 0.0.40
codegen_flags: <defaults>
</compile_context>

<pallas_src>
import functools
import math

import jax
import jax.numpy as jnp
from jax import lax
from jax.experimental import pallas as pl
from jax.experimental.pallas import tpu as pltpu


# ----------------------------------------------------------------------------
# Stage 1: fused K/V projection  (grid = (B, S // seq_tile))
#   x (B, S, D) f32  ->  kv (B, S, 2D) bf16, lane-dense (K | V concatenated)
# ----------------------------------------------------------------------------
def kv_proj_kernel(x_ref, wkv_ref, bkv_ref, kv_ref):
    x = x_ref[0].astype(jnp.bfloat16)                                   # (TS, D)
    kv = jnp.dot(x, wkv_ref[...],
                 preferred_element_type=jnp.float32) + bkv_ref[...]     # (TS, 2D) f32
    kv_ref[0] = kv.astype(jnp.bfloat16)                                 # one unmasked store


# ----------------------------------------------------------------------------
# Stage 2: Q proj + per-head attention + output proj + LN1 + FFN + LN2
#   grid = (B, S // q_tile)
# ----------------------------------------------------------------------------
def attn_ffn_kernel(x_ref, kv_ref, mask_ref,
                    wq_ref, bq_ref, wo_ref, bo_ref, g1_ref, be1_ref,
                    w1_ref, b1_ref, w2_ref, b2_ref, g2_ref, be2_ref,
                    out_ref, attn_ref, acc_ref,
                    *, num_heads, head_dim, d_model, eps, ff_chunk, bf16_exp):
    x = x_ref[0]                                  # (TQ, D)  f32 residual
    x_bf = x.astype(jnp.bfloat16)

    # Q projection (1/sqrt(Dh) already folded into wq / bq host-side).
    q_all = (jnp.dot(x_bf, wq_ref[...], preferred_element_type=jnp.float32)
             + bq_ref[...]).astype(jnp.bfloat16)                        # (TQ, D)

    # Additive mask bias, hoisted out of the head loop ({0,1} float mask).
    mask_bias = jnp.where(mask_ref[0] > 0.5, 0.0, -1e9)                 # (1, S) f32

    # Attention output accumulator (also reused for the FFN accumulator).
    acc_ref[...] = jnp.zeros_like(acc_ref)

    # --- per-head attention: bounds live f32 temporaries to (TQ, S) ----------
    for h in range(num_heads):                     # static, small
        lo = h * head_dim
        q_h = q_all[:, lo:lo + head_dim]                                # (TQ, Dh) bf16
        k_h = kv_ref[0, :, lo:lo + head_dim]                            # (S, Dh)  bf16
        v_h = kv_ref[0, :, d_model + lo:d_model + lo + head_dim]        # (S, Dh)  bf16

        s_h = lax.dot_general(q_h, k_h, (((1,), (1,)), ((), ())),
                              preferred_element_type=jnp.float32)       # (TQ, S)
        s_h = s_h + mask_bias
        m = jnp.max(s_h, axis=-1, keepdims=True)
        if bf16_exp:                               # v6e/v7x: bf16 EUP throughput
            p = jnp.exp((s_h - m).astype(jnp.bfloat16)).astype(jnp.float32)
        else:
            p = jnp.exp(s_h - m)
        denom = jnp.sum(p, axis=-1, keepdims=True)
        probs = p * pl.reciprocal(denom, approx=True)                   # (TQ, S) f32
        attn_ref[0, h] = probs.astype(attn_ref.dtype)

        ctx = jnp.dot(probs.astype(jnp.bfloat16), v_h,
                      preferred_element_type=jnp.float32)               # (TQ, Dh)
        # Fused output projection: wo reshaped host-side to (H, Dh, D).
        acc_ref[...] += jnp.dot(ctx.astype(jnp.bfloat16), wo_ref[h],
                                preferred_element_type=jnp.float32)

    attn_out = acc_ref[...] + bo_ref[...]

    # --- residual + LayerNorm1 (dropout = identity) ---------------------------
    x1 = attn_out + x
    mu1 = jnp.mean(x1, axis=-1, keepdims=True)
    xc1 = x1 - mu1
    var1 = jnp.mean(xc1 * xc1, axis=-1, keepdims=True)
    x1n = xc1 * lax.rsqrt(var1 + eps) * g1_ref[...] + be1_ref[...]

    # --- feed-forward network, chunked over d_ff, ref-based accumulator ------
    x1n_bf = x1n.astype(jnp.bfloat16)
    acc_ref[...] = jnp.zeros_like(acc_ref)
    n_chunks = w1_ref.shape[1] // ff_chunk

    def ff_body(c, carry):
        off = pl.multiple_of(c * ff_chunk, ff_chunk)
        hid = (jnp.dot(x1n_bf, w1_ref[:, pl.ds(off, ff_chunk)],
                       preferred_element_type=jnp.float32)
               + b1_ref[:, pl.ds(off, ff_chunk)])
        hid = jnp.maximum(hid, 0.0).astype(jnp.bfloat16)                # ReLU
        acc_ref[...] += jnp.dot(hid, w2_ref[pl.ds(off, ff_chunk), :],
                                preferred_element_type=jnp.float32)
        return carry

    lax.fori_loop(0, n_chunks, ff_body, 0, unroll=True)
    ff = acc_ref[...] + b2_ref[...]

    # --- residual + LayerNorm2 (dropout = identity) ---------------------------
    x2 = ff + x1n
    mu2 = jnp.mean(x2, axis=-1, keepdims=True)
    xc2 = x2 - mu2
    var2 = jnp.mean(xc2 * xc2, axis=-1, keepdims=True)
    y = xc2 * lax.rsqrt(var2 + eps) * g2_ref[...] + be2_ref[...]

    out_ref[0] = y


# ----------------------------------------------------------------------------
# Wrapper
# ----------------------------------------------------------------------------
def _vmem_limit_bytes():
    try:
        cap = pltpu.get_tpu_info().vmem_capacity_bytes
    except Exception:
        return 48 * 1024 * 1024          # conservative (fits v7x's 64 MiB)
    return int(min(cap * 3 // 4, 100 * 1024 * 1024))


def encoder_layer(x, padding_mask, params, *, num_heads, q_tile=None,
                  ff_chunk=None, attn_dtype=jnp.bfloat16, bf16_exp=False,
                  single_buffer_invariants=True):
    """x: (B, S, D) f32; padding_mask: (B, 1, S) float {0,1} (1 = keep, 0 = pad).

    `params` are the kernel-layout params produced by `prepare_params`.
    Returns (y f32 (B,S,D), attention_probs `attn_dtype` (B,H,S,S)).
    """
    B, S, D = x.shape
    head_dim = D // num_heads
    assert head_dim * num_heads == D
    d_ff = params["w1"].shape[1]

    vmem_limit = _vmem_limit_bytes()

    if q_tile is None:
        if S <= 128:
            q_tile = S
        elif vmem_limit >= 80 * 1024 * 1024 and S % 256 == 0:
            q_tile = 256          # v5e/v6e (128 MiB VMEM): bigger tiles amortize overhead
        else:
            q_tile = 128          # v7x (64 MiB VMEM): keep per-step footprint small
    assert S % q_tile == 0
    if ff_chunk is None:
        ff_chunk = d_ff if d_ff <= 512 else 512
    assert d_ff % ff_chunk == 0

    cp = pltpu.CompilerParams(dimension_semantics=("parallel", "parallel"),
                              vmem_limit_bytes=vmem_limit)
    # Single-buffer grid-invariant / slowly-varying blocks (weights, K/V slab).
    sb = dict(pipeline_mode=pl.Buffered(1)) if single_buffer_invariants else {}

    # ---- Stage 1: fused K/V projection -> lane-dense (B, S, 2D) bf16 slab ----
    kv = pl.pallas_call(
        kv_proj_kernel,
        grid=(B, S // q_tile),
        in_specs=[
            pl.BlockSpec((1, q_tile, D), lambda b, s: (b, s, 0)),
            pl.BlockSpec((D, 2 * D), lambda b, s: (0, 0), **sb),
            pl.BlockSpec((1, 2 * D), lambda b, s: (0, 0)),
        ],
        out_specs=pl.BlockSpec((1, q_tile, 2 * D), lambda b, s: (b, s, 0)),
        out_shape=jax.ShapeDtypeStruct((B, S, 2 * D), jnp.bfloat16),
        compiler_params=cp,
    )(x, params["wkv"], params["bkv"])

    # ---- Stage 2: Q proj + attention + FFN -----------------------------------
    kernel = functools.partial(
        attn_ffn_kernel, num_heads=num_heads, head_dim=head_dim,
        d_model=D, eps=1e-5, ff_chunk=ff_chunk, bf16_exp=bf16_exp)

    def const_spec(name, buffered=False):
        shape = params[name].shape
        nd = len(shape)
        kw = sb if buffered else {}
        return pl.BlockSpec(shape, lambda b, qi: (0,) * nd, **kw)

    in_specs = [
        pl.BlockSpec((1, q_tile, D), lambda b, qi: (b, qi, 0)),        # x
        pl.BlockSpec((1, S, 2 * D), lambda b, qi: (b, 0, 0), **sb),    # kv (K|V)
        pl.BlockSpec((1, 1, S), lambda b, qi: (b, 0, 0)),              # mask
        const_spec("wq", buffered=True), const_spec("bq"),
        const_spec("wo", buffered=True), const_spec("bo"),
        const_spec("g1"), const_spec("be1"),
        const_spec("w1", buffered=True), const_spec("b1"),
        const_spec("w2", buffered=True), const_spec("b2"),
        const_spec("g2"), const_spec("be2"),
    ]
    out_shapes = (
        jax.ShapeDtypeStruct((B, S, D), jnp.float32),
        jax.ShapeDtypeStruct((B, num_heads, S, S), attn_dtype),
    )
    out_specs = (
        pl.BlockSpec((1, q_tile, D), lambda b, qi: (b, qi, 0)),
        pl.BlockSpec((1, num_heads, q_tile, S), lambda b, qi: (b, 0, qi, 0)),
    )
    weight_order = ["wq", "bq", "wo", "bo", "g1", "be1",
                    "w1", "b1", "w2", "b2", "g2", "be2"]

    y, attn = pl.pallas_call(
        kernel,
        grid=(B, S // q_tile),
        in_specs=in_specs,
        out_specs=out_specs,
        out_shape=out_shapes,
        scratch_shapes=[pltpu.VMEM((q_tile, D), jnp.float32)],
        compiler_params=cp,
    )(x, kv, padding_mask, *[params[n] for n in weight_order])
    return y, attn


# ----------------------------------------------------------------------------
# Parameters: torch-like (f32) layout + one-time host-side kernel preparation
# ----------------------------------------------------------------------------
def init_torch_params(key, d_model, d_ff):
    ks = jax.random.split(key, 12)
    s = 0.02

    def w(k, shape):
        return jax.random.normal(k, shape, jnp.float32) * s

    return {
        "wq": w(ks[0], (d_model, d_model)), "bq": w(ks[1], (1, d_model)),
        "wk": w(ks[2], (d_model, d_model)), "bk": w(ks[3], (1, d_model)),
        "wv": w(ks[4], (d_model, d_model)), "bv": w(ks[5], (1, d_model)),
        "wo": w(ks[6], (d_model, d_model)), "bo": w(ks[7], (1, d_model)),
        "g1": jnp.ones((1, d_model), jnp.float32),
        "be1": jnp.zeros((1, d_model), jnp.float32),
        "w1": w(ks[8], (d_model, d_ff)), "b1": w(ks[9], (1, d_ff)),
        "w2": w(ks[10], (d_ff, d_model)), "b2": w(ks[11], (1, d_model)),
        "g2": jnp.ones((1, d_model), jnp.float32),
        "be2": jnp.zeros((1, d_model), jnp.float32),
    }


def prepare_params(p, num_heads):
    """One-time host-side transform: fold 1/sqrt(Dh) into wq/bq, fuse wk|wv,
    reshape wo to (H, Dh, D), cast matmul weights to bf16."""
    d_model = p["wq"].shape[0]
    head_dim = d_model // num_heads
    scale = 1.0 / math.sqrt(head_dim)
    return {
        "wq": (p["wq"] * scale).astype(jnp.bfloat16),
        "bq": p["bq"] * scale,
        "wkv": jnp.concatenate([p["wk"], p["wv"]], axis=1).astype(jnp.bfloat16),
        "bkv": jnp.concatenate([p["bk"], p["bv"]], axis=1),
        "wo": p["wo"].reshape(num_heads, head_dim, d_model).astype(jnp.bfloat16),
        "bo": p["bo"],
        "g1": p["g1"], "be1": p["be1"],
        "w1": p["w1"].astype(jnp.bfloat16), "b1": p["b1"],
        "w2": p["w2"].astype(jnp.bfloat16), "b2": p["b2"],
        "g2": p["g2"], "be2": p["be2"],
    }


# ----------------------------------------------------------------------------
# Pure-JAX f32 reference (mirrors the PyTorch module, dropout = identity)
# ----------------------------------------------------------------------------
def encoder_layer_ref(x, mask, p, *, num_heads):
    B, S, D = x.shape
    Dh = D // num_heads
    q = x @ p["wq"] + p["bq"]
    k = x @ p["wk"] + p["bk"]
    v = x @ p["wv"] + p["bv"]

    def heads(a):
        return a.reshape(B, S, num_heads, Dh).transpose(0, 2, 1, 3)

    qh, kh, vh = heads(q), heads(k), heads(v)
    scores = jnp.einsum('bhqd,bhkd->bhqk', qh, kh) / math.sqrt(Dh)
    bias = jnp.where(mask[:, None, :, :] > 0.5, 0.0, -1e9)            # (B,1,1,S)
    probs = jax.nn.softmax(scores + bias, axis=-1)
    ctx = jnp.einsum('bhqk,bhkd->bhqd', probs, vh).transpose(0, 2, 1, 3).reshape(B, S, D)
    attn_out = ctx @ p["wo"] + p["bo"]

    def ln(z, g, b):
        mu = z.mean(-1, keepdims=True)
        var = ((z - mu) ** 2).mean(-1, keepdims=True)
        return (z - mu) * lax.rsqrt(var + 1e-5) * g + b

    x1 = ln(attn_out + x, p["g1"], p["be1"])
    hid = jnp.maximum(x1 @ p["w1"] + p["b1"], 0.0)
    ff = hid @ p["w2"] + p["b2"]
    y = ln(ff + x1, p["g2"], p["be2"])
    return y, probs


if __name__ == "__main__":
    # Small shapes consistent with the module: batch=2, seq=8, d_model=32,
    # heads=4, d_ff=64. Dropout p is irrelevant (identity at inference).
    B, S, D, H, D_FF = 2, 8, 32, 4, 64

    key = jax.random.PRNGKey(0)
    k_x, k_p = jax.random.split(key)
    x = jax.random.normal(k_x, (B, S, D), jnp.float32)

    # padding mask: batch 0 fully valid, batch 1 has last 3 tokens padded.
    padding_mask = jnp.ones((B, 1, S), jnp.float32)
    padding_mask = padding_mask.at[1, 0, S - 3:].set(0.0)

    torch_params = init_torch_params(k_p, D, D_FF)
    kparams = prepare_params(torch_params, H)

    try:
        y, attn = encoder_layer(x, padding_mask, kparams, num_heads=H)
    except Exception:
        # Portability guard: jax builds without BlockSpec pipeline_mode support.
        y, attn = encoder_layer(x, padding_mask, kparams, num_heads=H,
                                single_buffer_invariants=False)
    jax.block_until_ready((y, attn))

    y_ref, attn_probs_ref = encoder_layer_ref(x, padding_mask, torch_params, num_heads=H)

    assert y.shape == (B, S, D)
    assert attn.shape == (B, H, S, S)
    attn_f32 = attn.astype(jnp.float32)
    assert bool(jnp.all(jnp.isfinite(y))) and bool(jnp.all(jnp.isfinite(attn_f32)))
    # attention rows sum to ~1 (approx reciprocal + bf16 storage -> loose tol)
    assert bool(jnp.allclose(jnp.sum(attn_f32, axis=-1), 1.0, atol=2e-2))
    # match the f32 reference within bf16-matmul / bf16-storage tolerance
    assert float(jnp.max(jnp.abs(attn_f32 - attn_probs_ref))) < 3e-2
    assert float(jnp.max(jnp.abs(y - y_ref))) < 5e-2

    print("KERNEL_OK")
</pallas_src>

<mosaic_0001>
module attributes {stable_mosaic.version = 11 : i64} {
  func.func @kv_proj_kernel(%arg0: i32, %arg1: i32, %arg2: memref<1x8x32xf32, #tpu.memory_space<vmem>>, %arg3: memref<32x64xbf16, #tpu.memory_space<vmem>>, %arg4: memref<1x64xf32, #tpu.memory_space<vmem>>, %arg5: memref<1x8x64xbf16, #tpu.memory_space<vmem>>) attributes {dimension_semantics = [#tpu.dimension_semantics<parallel>, #tpu.dimension_semantics<parallel>], iteration_bounds = array<i64: 2, 1>, scalar_prefetch = 0 : i64, scratch_operands = 0 : i64, tpu.core_type = #tpu.core_type<tc>, window_params = [{transform_indices = @transform_0, window_bounds = array<i64: 1, 8, 32>}, {pipeline_mode = #tpu.pipeline_mode<synchronous>, transform_indices = @transform_1, window_bounds = array<i64: 32, 64>}, {pipeline_mode = #tpu.pipeline_mode<synchronous>, transform_indices = @transform_2, window_bounds = array<i64: 1, 64>}, {transform_indices = @transform_3, window_bounds = array<i64: 1, 8, 64>}]} {
    %c0 = arith.constant 0 : index
    %c0_0 = arith.constant 0 : index
    %c0_1 = arith.constant 0 : index
    %0 = vector.load %arg2[%c0, %c0_0, %c0_1] : memref<1x8x32xf32, #tpu.memory_space<vmem>>, vector<1x8x32xf32>
    %1 = vector.shape_cast %0 : vector<1x8x32xf32> to vector<8x32xf32>
    %2 = arith.truncf %1 : vector<8x32xf32> to vector<8x32xbf16>
    %c0_2 = arith.constant 0 : index
    %c0_3 = arith.constant 0 : index
    %3 = vector.load %arg3[%c0_2, %c0_3] : memref<32x64xbf16, #tpu.memory_space<vmem>>, vector<32x64xbf16>
    %cst = arith.constant dense<0.000000e+00> : vector<8x64xf32>
    %4 = tpu.matmul %2, %3, %cst {dimension_numbers = #tpu.dot_dimension_numbers<[1], [0], [0], [1], [0, 0, 1, 1], [], []>} : vector<8x32xbf16>, vector<32x64xbf16>, vector<8x64xf32> -> vector<8x64xf32>
    %c0_4 = arith.constant 0 : index
    %c0_5 = arith.constant 0 : index
    %5 = vector.load %arg4[%c0_4, %c0_5] : memref<1x64xf32, #tpu.memory_space<vmem>>, vector<1x64xf32>
    %6 = vector.broadcast %5 : vector<1x64xf32> to vector<8x64xf32>
    %7 = arith.addf %4, %6 : vector<8x64xf32>
    %8 = arith.truncf %7 : vector<8x64xf32> to vector<8x64xbf16>
    %c0_6 = arith.constant 0 : index
    %c0_7 = arith.constant 0 : index
    %c0_8 = arith.constant 0 : index
    %9 = vector.load %arg5[%c0_6, %c0_7, %c0_8] : memref<1x8x64xbf16, #tpu.memory_space<vmem>>, vector<1x8x64xbf16>
    %10 = vector.shape_cast %9 : vector<1x8x64xbf16> to vector<8x64xbf16>
    %11 = vector.shape_cast %8 : vector<8x64xbf16> to vector<1x8x64xbf16>
    tpu.vector_store %arg5[%c0_6, %c0_7, %c0_8], %11 {strides = array<i32>} : memref<1x8x64xbf16, #tpu.memory_space<vmem>>, vector<1x8x64xbf16>,
    return
  }
  func.func @transform_0(%arg0: i32, %arg1: i32) -> (i32, i32, i32) {
    %c0_i32 = arith.constant 0 : i32
    %c0_i32_0 = arith.constant 0 : i32
    return %arg0, %arg1, %c0_i32 : i32, i32, i32
  }
  func.func @transform_1(%arg0: i32, %arg1: i32) -> (i32, i32) {
    %c0_i32 = arith.constant 0 : i32
    %c0_i32_0 = arith.constant 0 : i32
    %c0_i32_1 = arith.constant 0 : i32
    return %c0_i32, %c0_i32_0 : i32, i32
  }
  func.func @transform_2(%arg0: i32, %arg1: i32) -> (i32, i32) {
    %c0_i32 = arith.constant 0 : i32
    %c0_i32_0 = arith.constant 0 : i32
    %c0_i32_1 = arith.constant 0 : i32
    return %c0_i32, %c0_i32_0 : i32, i32
  }
  func.func @transform_3(%arg0: i32, %arg1: i32) -> (i32, i32, i32) {
    %c0_i32 = arith.constant 0 : i32
    %c0_i32_0 = arith.constant 0 : i32
    return %arg0, %arg1, %c0_i32 : i32, i32, i32
  }
}

module attributes {stable_mosaic.version = 11 : i64} {
  func.func @kv_proj_kernel(%arg0: i32, %arg1: i32, %arg2: memref<1x8x32xf32, #tpu.memory_space<vmem>>, %arg3: memref<32x64xbf16, #tpu.memory_space<vmem>>, %arg4: memref<1x64xf32, #tpu.memory_space<vmem>>, %arg5: memref<1x8x64xbf16, #tpu.memory_space<vmem>>) attributes {dimension_semantics = [#tpu.dimension_semantics<parallel>, #tpu.dimension_semantics<parallel>], iteration_bounds = array<i64: 2, 1>, scalar_prefetch = 0 : i64, scratch_operands = 0 : i64, tpu.core_type = #tpu.core_type<tc>, window_params = [{transform_indices = @transform_0, window_bounds = array<i64: 1, 8, 32>}, {pipeline_mode = #tpu.pipeline_mode<synchronous>, transform_indices = @transform_1, window_bounds = array<i64: 32, 64>}, {pipeline_mode = #tpu.pipeline_mode<synchronous>, transform_indices = @transform_2, window_bounds = array<i64: 1, 64>}, {transform_indices = @transform_3, window_bounds = array<i64: 1, 8, 64>}]} {
    %c0 = arith.constant 0 : index
    %c0_0 = arith.constant 0 : index
    %c0_1 = arith.constant 0 : index
    %0 = vector.load %arg2[%c0, %c0_0, %c0_1] : memref<1x8x32xf32, #tpu.memory_space<vmem>>, vector<1x8x32xf32>
    %1 = vector.shape_cast %0 : vector<1x8x32xf32> to vector<8x32xf32>
    %2 = arith.truncf %1 : vector<8x32xf32> to vector<8x32xbf16>
    %c0_2 = arith.constant 0 : index
    %c0_3 = arith.constant 0 : index
    %3 = vector.load %arg3[%c0_2, %c0_3] : memref<32x64xbf16, #tpu.memory_space<vmem>>, vector<32x64xbf16>
    %cst = arith.constant dense<0.000000e+00> : vector<8x64xf32>
    %4 = tpu.matmul %2, %3, %cst {dimension_numbers = #tpu.dot_dimension_numbers<[1], [0], [0], [1], [0, 0, 1, 1], [], []>} : vector<8x32xbf16>, vector<32x64xbf16>, vector<8x64xf32> -> vector<8x64xf32>
    %c0_4 = arith.constant 0 : index
    %c0_5 = arith.constant 0 : index
    %5 = vector.load %arg4[%c0_4, %c0_5] : memref<1x64xf32, #tpu.memory_space<vmem>>, vector<1x64xf32>
    %6 = vector.broadcast %5 : vector<1x64xf32> to vector<8x64xf32>
    %7 = arith.addf %4, %6 : vector<8x64xf32>
    %8 = arith.truncf %7 : vector<8x64xf32> to vector<8x64xbf16>
    %c0_6 = arith.constant 0 : index
    %c0_7 = arith.constant 0 : index
    %c0_8 = arith.constant 0 : index
    %9 = vector.load %arg5[%c0_6, %c0_7, %c0_8] : memref<1x8x64xbf16, #tpu.memory_space<vmem>>, vector<1x8x64xbf16>
    %10 = vector.shape_cast %9 : vector<1x8x64xbf16> to vector<8x64xbf16>
    %11 = vector.shape_cast %8 : vector<8x64xbf16> to vector<1x8x64xbf16>
    tpu.vector_store %arg5[%c0_6, %c0_7, %c0_8], %11 {strides = array<i32>} : memref<1x8x64xbf16, #tpu.memory_space<vmem>>, vector<1x8x64xbf16>,
    return
  }
  func.func @transform_0(%arg0: i32, %arg1: i32) -> (i32, i32, i32) {
    %c0_i32 = arith.constant 0 : i32
    %c0_i32_0 = arith.constant 0 : i32
    return %arg0, %arg1, %c0_i32 : i32, i32, i32
  }
  func.func @transform_1(%arg0: i32, %arg1: i32) -> (i32, i32) {
    %c0_i32 = arith.constant 0 : i32
    %c0_i32_0 = arith.constant 0 : i32
    %c0_i32_1 = arith.constant 0 : i32
    return %c0_i32, %c0_i32_0 : i32, i32
  }
  func.func @transform_2(%arg0: i32, %arg1: i32) -> (i32, i32) {
    %c0_i32 = arith.constant 0 : i32
    %c0_i32_0 = arith.constant 0 : i32
    %c0_i32_1 = arith.constant 0 : i32
    return %c0_i32, %c0_i32_0 : i32, i32
  }
  func.func @transform_3(%arg0: i32, %arg1: i32) -> (i32, i32, i32) {
    %c0_i32 = arith.constant 0 : i32
    %c0_i32_0 = arith.constant 0 : i32
    return %arg0, %arg1, %c0_i32 : i32, i32, i32
  }
}

</mosaic_0001>

<bundles_post_ra>
// kernel: tpu_custom_call.1
= control target key start
LH: loop header
LB: loop body
LE: loop exit
PB: predicated region body
PF: predicated region fallthrough
CT: control target
= control target key end

     0   :  { %8 = vsyncpa [#allocation3], 0  ;;  %s896_s0 = inlined_call_operand.hbm [shape: f32[2,8,32], index: 0, kind: input, shape index: {}]   ;;  %s897_s1 = inlined_call_operand.hbm [shape: bf16[32,64], index: 1, kind: input, shape index: {}]   ;;  %s898_s2 = inlined_call_operand.vmem [shape: f32[1,64], index: 2, kind: input, shape index: {}]   ;;  %s899_s3 = inlined_call_operand.hbm [shape: bf16[2,8,64], index: 3, kind: output, shape index: {}]  }
   0x1   :  { %10 = vsyncpa [#allocation3 + $0x1], 0 }
   0x2   :  { %11 = vsyncpa [#allocation6], 0 }
   0x3   :  { %12 = vsyncpa [#allocation4], 0 }
   0x4   :  { %14 = vsyncpa [#allocation4 + $0x1], 0  ;;  %s678_s12 = smov 0   ;;  %s680_s13 = smov 0  }
   0x5   :  { %s682_s14 = smov 0   ;;  %s684_s15 = smov 0  }
   0x6   :  { %s686_s16 = smov 0   ;;  %s688_s17 = smov 0  }
   0x7 LB: > { %s396_s18 = sadd.s32 4294967295, %s649_s17   ;;  %s397_s19 = sadd.s32 4294967294, %s649_s17   ;;  %s649_s17 = sphi %s688_s17, %s20_s17   ;;  %s645_s16 = sphi %s686_s16, %s923_s16   ;;  %s641_s15 = sphi %s684_s15, %s922_s15   ;;  %s637_s14 = sphi %s682_s14, %s921_s14   ;;  %s633_s13 = sphi %s680_s13, %s920_s13   ;;  %s629_s12 = sphi %s678_s12, %s919_s12  }
   0x8   : > { %p54_p0 = scmp.ne.s32.totalorder %s633_s13, %s629_s12  ;;  %p712_p1 = scmp.eq.s32.totalorder %s396_s18, 0 }
   0x9   : > { %p716_p2 = scmp.eq.s32.totalorder %s396_s18, 1  ;;  %p128_p3 = scmp.eq.s32.totalorder %s397_s19, 1 }
   0xa   : > { %s904_s20 = scalar_select %p712_p1, 1, 0 }
   0xb   : > { %s905_s21 = scalar_select %p716_p2, 1, 0 }
   0xc   : > { %p722_p4 = por %p712_p1, %p54_p0  ;;  %p398_p5 = scmp.ge.s32.totalorder %s649_s17, 1 }
   0xd   : > { %p727_p6 = por %p128_p3, %p54_p0  ;;  %p135_p7 = scmp.lt.s32.totalorder %s649_s17, 3 }
   0xe   : > { %s906_s22 = scalar_select %p722_p4, 1, 0 }
   0xf   : > { %s907_s23 = scalar_select %p727_p6, 1, 0 }
  0x10   : > { %p732_p8 = pnand %p398_p5, %p135_p7  ;;  %s651_s25 = smov [#allocation5]  }
  0x11   : > { %s147_s26 = sshll.u32 %s651_s25, 4  ;;  %s32_s28 = sadd.s32 1, %s645_s16  ;;  %s148_s26 = int_to_ptr.vmem [resolvable:$true] %s147_s26 }
  0x12   : > { %s908_s24 = scalar_select %p732_p8, 1, 0 }
  0x13   : > { %p434_p9 = pneg %p732_p8  ;;  %s505_s4 = scalar_lea.hbm %s897_s1, 256 }
  0x14   : > { %p506_p12 = scmp.ne.s32.totalorder %s897_s1, %s505_s4  ;;  %p512_p5 = scmp.lt.u32.totalorder %s505_s4, %s897_s1 }
  0x15   : > { %p741_p11 = pnand %p434_p9, %p712_p1 }
  0x17   : > { %p507_p13 = pneg %p741_p11 }
  0x19   : > { %p508_p0 = pnand %p507_p13, %p506_p12 }
  0x1b   : > { %p509_p3 = pneg %p508_p0 }
  0x1d   : > { %p514_p7 = pnand %p512_p5, %p509_p3 }
  0x1f   : > { %517 = shalt.err (!%p514_p7)
}
  0x20   : > { %s518_s9 = scalar_lea.vmem %s148_s26, 256  ;;  %p526_p1 = scmp.lt.s32.totalorder %s148_s26, %s148_s26 }
  0x21   : > { %p519_p9 = scmp.ne.s32.totalorder %s148_s26, %s518_s9  ;;  %p527_p4 = scmp.lt.s32.totalorder %s518_s9, %s518_s9 }
  0x23   : > { %p521_p10 = pnand %p519_p9, %p507_p13  ;;  %p528_p8 = por %p527_p4, %p526_p1 }
  0x25   : > { %p522_p6 = pneg %p521_p10 }
  0x27   : > { %p529_p2 = pnand %p528_p8, %p522_p6 }
  0x29   : > { %532 = shalt.err (!%p529_p2)
}
  0x2a   : > { %s652_s10 = smov 64   ;;  %s653_s11 = smov 4  }
  0x2b   : > { %437 = dma.hbm_to_vmem [thread:$0]  (!%p741_p11), %s897_s1, 256, %s148_s26, [#allocation6], %s652_s10, %s652_s10, %s653_s11  }
  0x2c   : > { %p34_p1 = scmp.ge.s32.totalorder %s32_s28, 2  ;;  %s41_s25 = sadd.s32 1, %s637_s14 }
  0x2d   : > { %p48_p2 = scmp.ne.s32.totalorder %s637_s14, %s633_s13  ;;  %p49_p4 = scmp.eq.s32.totalorder %s649_s17, 0 }
  0x2e   : > { %s925_s28 = smov (%p34_p1, %s32_s28), 0  ;;  %p911_p8 = scmp.ne.s32.totalorder %s905_s21, 0 }
  0x2f   : > { %p768_p6 = por %p49_p4, %p48_p2  ;;  %s36_s27 = ssub.s32 %s645_s16, %s925_s28 }
  0x30   : > { %p774_p10 = por %p911_p8, %p48_p2  ;;  %p447_p12 = scmp.lt.s32.totalorder %s649_s17, 2 }
  0x31   : > { %p39_p11 = scmp.eq.s32.totalorder %s36_s27, 0  ;;  %s164_s26 = sand.u32 1, %s637_s14  }
  0x32   : > { %s401_s4 = sshll.u32 %s164_s26, 3  ;;  %s402_s6 = sshll.u32 %s645_s16, 7 }
  0x33   : > { %s783_s5 = scalar_select %p39_p11, %s637_s14, %s41_s25  }
  0x34   : > { %s789_s9 = scalar_lea.hbm %s896_s0, %s402_s6  ;;  %s168_s21 = scalar_lea.vmem [#allocation2], %s401_s4 }
  0x35   : > { %s176_s10 = sshll.u32 %s168_s21, 4  ;;  %p795_p13 = pnand %p447_p12, %p768_p6  ;;  %s791_s10 = int_to_ptr.vmem [resolvable:$true] %s176_s10 }
  0x36   : > { %s165_s18 = scalar_lea.sflag [#allocation3], %s164_s26  ;;  %s533_s19 = scalar_lea.hbm %s789_s9, 128 }
  0x37   : > { %p534_p0 = scmp.ne.s32.totalorder %s789_s9, %s533_s19  ;;  %p535_p3 = pneg %p795_p13 }
  0x38   : > { %s538_s4 = scalar_lea.hbm %s896_s0, 256  ;;  %p539_p9 = scmp.lt.u32.totalorder %s789_s9, %s896_s0 }
  0x39   : > { %p536_p5 = pnand %p535_p3, %p534_p0  ;;  %p540_p1 = scmp.lt.u32.totalorder %s538_s4, %s533_s19 }
  0x3a   : > { %p542_p4 = scmp.lt.u32.totalorder %s533_s19, %s789_s9 }
  0x3b   : > { %p537_p7 = pneg %p536_p5  ;;  %p541_p2 = por %p540_p1, %p539_p9 }
  0x3d   : > { %p543_p6 = por %p542_p4, %p541_p2 }
  0x3f   : > { %p544_p8 = pnand %p543_p6, %p537_p7 }
  0x41   : > { %547 = shalt.err (!%p544_p8)
}
  0x42   : > { %s548_s26 = scalar_lea.vmem %s791_s10, 128  ;;  %s654_s7 = smov [#allocation2]  }
  0x43   : > { %p549_p12 = scmp.ne.s32.totalorder %s791_s10, %s548_s26  ;;  %s553_s8 = sshll.u32 %s654_s7, 4  ;;  %s554_s8 = int_to_ptr.vmem [resolvable:$false] %s553_s8 }
  0x44   : > { %s555_s21 = scalar_lea.vmem %s554_s8, 256  ;;  %p556_p5 = scmp.lt.s32.totalorder %s791_s10, %s554_s8 }
  0x45   : > { %p551_p11 = pnand %p549_p12, %p535_p3  ;;  %p557_p9 = scmp.lt.s32.totalorder %s555_s21, %s548_s26 }
  0x47   : > { %p552_p0 = pneg %p551_p11  ;;  %p558_p1 = por %p557_p9, %p556_p5 }
  0x49   : > { %p559_p2 = pnand %p558_p1, %p552_p0 }
  0x4b   : > { %562 = shalt.err (!%p559_p2)
}
  0x4c   : > { %441 = dma.hbm_to_vmem [thread:$0]  (!%p795_p13), %s789_s9, 128, %s791_s10, %s165_s18  }
  0x4d   : > { %p914_p7 = scmp.ne.s32.totalorder %s908_s24, 0 }
  0x4e   : > { %s827_s19 = sand.u32 (!%p914_p7), 1, %s633_s13   ;;  %p915_p3 = scmp.ne.s32.totalorder (!%p914_p7), %s906_s22, 0 }
  0x4f   : > { %185 = sbr.rel (%p914_p7) target bundleno = 329 (0x149), region = 32  ;;  %s404_s25 = sshll.u32 (!%p914_p7), %s827_s19, 3 }
  0x50   : > { %s188_s27 = scalar_lea.sflag (!%p914_p7), [#allocation3], %s827_s19  ;;  %s191_s4 = scalar_lea.vmem (!%p914_p7), [#allocation2], %s404_s25 }
  0x56   : > { %616 = dma.done.wait (%p915_p3), %s188_s27, 128  }
  0x57   : > { %618 = vsyncadd (%p915_p3), %s188_s27, 4294967168  ;;  %p916_p4 = scmp.ne.s32.totalorder %s904_s20, 0 }
  0x59   : > { %620 = dma.done.wait (%p916_p4), [#allocation6], 256  }
  0x5a   : > { %622 = vsyncadd (%p916_p4), [#allocation6], 4294967040  ;;  %v655_v0 = vmov 0.0   ;;  %vm656_vm0 = vmmov 0   ;;  %v503_v1 = vld [vmem:[#allocation5] sm:$0xff]   ;;  %v504_v2 = vld [vmem:[#allocation5 + $0x8] sm:$0xff]  }
  0x5b   : > { %418 = vmatprep.subr.bf16.mxu0 %v655_v0  ;;  %422 = vmatprep.mubr.msk.bf16.mxu0 %vm656_vm0, %v655_v0  ;;  %v219_v3 = vld [vmem:[%s191_s4] sm:$0xff]  ;;  %vm244_vm1 = vcmask 261120   ;;  %s406_s22 = sshll.u32 %s827_s19, 2  ;;  %s412_s9 = sshll.u32 %s641_s15, 6  ;;  %vm289_vm2 = vcmask 519168  }
  0x5c   : > { %419 = vmatpush3.bf16.msra.mxu0 %v503_v1  ;;  %v220_v4 = vpack.c.bf16 %v219_v3, %v219_v3  ;;  %v407_v5 = vld [vmem:[%s898_s2] ss:$0 sm:$0xff]  ;;  %s217_s10 = scalar_lea.vmem [#allocation7], %s406_s22  ;;  %s847_s6 = scalar_lea.hbm %s899_s3, %s412_s9 }
  0x5d   : > { %420 = vmatprep.subr.bf16.mxu0 %v655_v0  ;;  %s306_s11 = sshll.u32 %s217_s10, 4  ;;  %s292_s15 = scalar_lea.sflag [#allocation4], %s827_s19  ;;  %s849_s11 = int_to_ptr.vmem [resolvable:$true] %s306_s11 }
  0x5e   : > { %s563_s26 = scalar_lea.vmem %s849_s11, 64  ;;  %s657_s7 = smov [#allocation7]  }
  0x5f   : > { %p564_p13 = scmp.ne.s32.totalorder %s849_s11, %s563_s26  ;;  %s567_s8 = sshll.u32 %s657_s7, 4  ;;  %s568_s8 = int_to_ptr.vmem [resolvable:$false] %s567_s8 }
  0x60   : > { %421 = vmatpush3.bf16.msra.mxu0 %v504_v2  ;;  %s569_s21 = scalar_lea.vmem %s568_s8, 128  ;;  %p570_p12 = scmp.lt.s32.totalorder %s849_s11, %s568_s8 }
  0x61   : > { %p565_p6 = pnand %p564_p13, %p774_p10  ;;  %p571_p11 = scmp.lt.s32.totalorder %s569_s21, %s563_s26 }
  0x63   : > { %423 = vmatmul.mubr.msk.bf16.vlgmr.msra.gmra.mrb[0].mxu0 %vm244_vm1, %v220_v4  ;;  %p566_p8 = pneg %p565_p6  ;;  %p572_p0 = por %p571_p11, %p570_p12 }
  0x65   : > { %p573_p5 = pnand %p572_p0, %p566_p8 }
 0x136   : > { %v282_v6 = vpop.f32.mrb[0].mxu0 }
 0x137   : > { %v283_v7 = vadd.f32 %v407_v5, %v282_v6  ;;  %v424_v8 = vpop.f32.mrb[1].mxu0 }
 0x138   : > { %v285_v9 = vpop.f32.mrb[2].mxu0 }
 0x139   : > { %v288_v10 = vpack.c.bf16 %v283_v7, %v283_v7  ;;  %v425_v11 = vpop.f32.mrb[3].mxu0 }
 0x13b   : > { %290 = vst.msk [vmem:[%s217_s10] sm:$0xf] %vm289_vm2, %v288_v10 }
 0x13c   : > { %576 = shalt.err (!%p573_p5)
}
 0x13d   : > { %s577_s19 = scalar_lea.hbm %s847_s6, 64  ;;  %s581_s4 = scalar_lea.hbm %s899_s3, 128 }
 0x13e   : > { %p578_p9 = scmp.ne.s32.totalorder %s847_s6, %s577_s19  ;;  %p582_p7 = scmp.lt.u32.totalorder %s847_s6, %s899_s3 }
 0x13f   : > { %p583_p3 = scmp.lt.u32.totalorder %s581_s4, %s577_s19  ;;  %p585_p13 = scmp.lt.u32.totalorder %s577_s19, %s847_s6 }
 0x140   : > { %p579_p1 = pnand %p578_p9, %p774_p10 }
 0x141   : > { %p584_p4 = por %p583_p3, %p582_p7 }
 0x142   : > { %p580_p2 = pneg %p579_p1 }
 0x143   : > { %p586_p6 = por %p585_p13, %p584_p4 }
 0x145   : > { %p587_p8 = pnand %p586_p6, %p580_p2 }
 0x147   : > { %590 = shalt.err (!%p587_p8)
}
 0x148   : > { %432 = dma.vmem_to_hbm [thread:$0]  (%p774_p10), %s849_s11, 64, %s847_s6, %s292_s15  }
 0x149 PF: > { %s318_s20 = sand.u32 1, %s629_s12   ;;  %p917_p12 = scmp.ne.s32.totalorder %s907_s23, 0 }
 0x14a   : > { %p918_p11 = scmp.ge.s32.totalorder %s649_s17, 2  ;;  %s319_s9 = scalar_lea.sflag [#allocation4], %s318_s20 }
 0x14c   : > { %p443_p0 = pnand %p918_p11, %p917_p12 }
 0x14e   : > { %624 = dma.done.wait (!%p443_p0), %s319_s9, 64  }
 0x14f   : > { %626 = vsyncadd (!%p443_p0), %s319_s9, 4294967232  ;;  %s20_s17 = sadd.s32 1, %s649_s17   ;;  %s919_s12 = smov %s633_s13 }
 0x150   : > { %p17_p5 = scmp.ge.s32.totalorder %s20_s17, 4   ;;  %s920_s13 = smov %s637_s14 }
 0x151   : > { %s921_s14 = smov %s783_s5  ;;  %s922_s15 = smov %s645_s16 }
 0x152   : > { %s923_s16 = smov %s925_s28  ;;  %19 = sbr.rel (!%p17_p5) target bundleno = 7 (0x7), region = 81 }
 0x159   :  { %324 = vsyncpa [#allocation3], 1 }
 0x15a   :  { %326 = vsyncpa [#allocation3 + $0x1], 1 }
 0x15b   :  { %327 = vsyncpa [#allocation6], 1 }
 0x15c   :  { %328 = vsyncpa [#allocation4], 1 }
 0x15d   :  { %330 = vsyncpa [#allocation4 + $0x1], 1 }

// kernel: tpu_custom_call.1
= control target key start
LH: loop header
LB: loop body
LE: loop exit
PB: predicated region body
PF: predicated region fallthrough
CT: control target
= control target key end

     0   :  { %8 = vsyncpa [#allocation3], 0  ;;  %s896_s0 = inlined_call_operand.hbm [shape: f32[2,8,32], index: 0, kind: input, shape index: {}]   ;;  %s897_s1 = inlined_call_operand.hbm [shape: bf16[32,64], index: 1, kind: input, shape index: {}]   ;;  %s898_s2 = inlined_call_operand.vmem [shape: f32[1,64], index: 2, kind: input, shape index: {}]   ;;  %s899_s3 = inlined_call_operand.hbm [shape: bf16[2,8,64], index: 3, kind: output, shape index: {}]  }
   0x1   :  { %10 = vsyncpa [#allocation3 + $0x1], 0 }
   0x2   :  { %11 = vsyncpa [#allocation6], 0 }
   0x3   :  { %12 = vsyncpa [#allocation4], 0 }
   0x4   :  { %14 = vsyncpa [#allocation4 + $0x1], 0  ;;  %s678_s12 = smov 0   ;;  %s680_s13 = smov 0  }
   0x5   :  { %s682_s14 = smov 0   ;;  %s684_s15 = smov 0  }
   0x6   :  { %s686_s16 = smov 0   ;;  %s688_s17 = smov 0  }
   0x7 LB: > { %s396_s18 = sadd.s32 4294967295, %s649_s17   ;;  %s397_s19 = sadd.s32 4294967294, %s649_s17   ;;  %s649_s17 = sphi %s688_s17, %s20_s17   ;;  %s645_s16 = sphi %s686_s16, %s923_s16   ;;  %s641_s15 = sphi %s684_s15, %s922_s15   ;;  %s637_s14 = sphi %s682_s14, %s921_s14   ;;  %s633_s13 = sphi %s680_s13, %s920_s13   ;;  %s629_s12 = sphi %s678_s12, %s919_s12  }
   0x8   : > { %p54_p0 = scmp.ne.s32.totalorder %s633_s13, %s629_s12  ;;  %p712_p1 = scmp.eq.s32.totalorder %s396_s18, 0 }
   0x9   : > { %p716_p2 = scmp.eq.s32.totalorder %s396_s18, 1  ;;  %p128_p3 = scmp.eq.s32.totalorder %s397_s19, 1 }
   0xa   : > { %s904_s20 = scalar_select %p712_p1, 1, 0 }
   0xb   : > { %s905_s21 = scalar_select %p716_p2, 1, 0 }
   0xc   : > { %p722_p4 = por %p712_p1, %p54_p0  ;;  %p398_p5 = scmp.ge.s32.totalorder %s649_s17, 1 }
   0xd   : > { %p727_p6 = por %p128_p3, %p54_p0  ;;  %p135_p7 = scmp.lt.s32.totalorder %s649_s17, 3 }
   0xe   : > { %s906_s22 = scalar_select %p722_p4, 1, 0 }
   0xf   : > { %s907_s23 = scalar_select %p727_p6, 1, 0 }
  0x10   : > { %p732_p8 = pnand %p398_p5, %p135_p7  ;;  %s651_s25 = smov [#allocation5]  }
  0x11   : > { %s147_s26 = sshll.u32 %s651_s25, 4  ;;  %s32_s28 = sadd.s32 1, %s645_s16  ;;  %s148_s26 = int_to_ptr.vmem [resolvable:$true] %s147_s26 }
  0x12   : > { %s908_s24 = scalar_select %p732_p8, 1, 0 }
  0x13   : > { %p434_p9 = pneg %p732_p8  ;;  %s505_s4 = scalar_lea.hbm %s897_s1, 256 }
  0x14   : > { %p506_p12 = scmp.ne.s32.totalorder %s897_s1, %s505_s4  ;;  %p512_p5 = scmp.lt.u32.totalorder %s505_s4, %s897_s1 }
  0x15   : > { %p741_p11 = pnand %p434_p9, %p712_p1 }
  0x17   : > { %p507_p13 = pneg %p741_p11 }
  0x19   : > { %p508_p0 = pnand %p507_p13, %p506_p12 }
  0x1b   : > { %p509_p3 = pneg %p508_p0 }
  0x1d   : > { %p514_p7 = pnand %p512_p5, %p509_p3 }
  0x1f   : > { %517 = shalt.err (!%p514_p7)
}
  0x20   : > { %s518_s9 = scalar_lea.vmem %s148_s26, 256  ;;  %p526_p1 = scmp.lt.s32.totalorder %s148_s26, %s148_s26 }
  0x21   : > { %p519_p9 = scmp.ne.s32.totalorder %s148_s26, %s518_s9  ;;  %p527_p4 = scmp.lt.s32.totalorder %s518_s9, %s518_s9 }
  0x23   : > { %p521_p10 = pnand %p519_p9, %p507_p13  ;;  %p528_p8 = por %p527_p4, %p526_p1 }
  0x25   : > { %p522_p6 = pneg %p521_p10 }
  0x27   : > { %p529_p2 = pnand %p528_p8, %p522_p6 }
  0x29   : > { %532 = shalt.err (!%p529_p2)
}
  0x2a   : > { %s652_s10 = smov 64   ;;  %s653_s11 = smov 4  }
  0x2b   : > { %437 = dma.hbm_to_vmem [thread:$0]  (!%p741_p11), %s897_s1, 256, %s148_s26, [#allocation6], %s652_s10, %s652_s10, %s653_s11  }
  0x2c   : > { %p34_p1 = scmp.ge.s32.totalorder %s32_s28, 2  ;;  %s41_s25 = sadd.s32 1, %s637_s14 }
  0x2d   : > { %p48_p2 = scmp.ne.s32.totalorder %s637_s14, %s633_s13  ;;  %p49_p4 = scmp.eq.s32.totalorder %s649_s17, 0 }
  0x2e   : > { %s925_s28 = smov (%p34_p1, %s32_s28), 0  ;;  %p911_p8 = scmp.ne.s32.totalorder %s905_s21, 0 }
  0x2f   : > { %p768_p6 = por %p49_p4, %p48_p2  ;;  %s36_s27 = ssub.s32 %s645_s16, %s925_s28 }
  0x30   : > { %p774_p10 = por %p911_p8, %p48_p2  ;;  %p447_p12 = scmp.lt.s32.totalorder %s649_s17, 2 }
  0x31   : > { %p39_p11 = scmp.eq.s32.totalorder %s36_s27, 0  ;;  %s164_s26 = sand.u32 1, %s637_s14  }
  0x32   : > { %s401_s4 = sshll.u32 %s164_s26, 3  ;;  %s402_s6 = sshll.u32 %s645_s16, 7 }
  0x33   : > { %s783_s5 = scalar_select %p39_p11, %s637_s14, %s41_s25  }
  0x34   : > { %s789_s9 = scalar_lea.hbm %s896_s0, %s402_s6  ;;  %s168_s21 = scalar_lea.vmem [#allocation2], %s401_s4 }
  0x35   : > { %s176_s10 = sshll.u32 %s168_s21, 4  ;;  %p795_p13 = pnand %p447_p12, %p768_p6  ;;  %s791_s10 = int_to_ptr.vmem [resolvable:$true] %s176_s10 }
  0x36   : > { %s165_s18 = scalar_lea.sflag [#allocation3], %s164_s26  ;;  %s533_s19 = scalar_lea.hbm %s789_s9, 128 }
  0x37   : > { %p534_p0 = scmp.ne.s32.totalorder %s789_s9, %s533_s19  ;;  %p535_p3 = pneg %p795_p13 }
  0x38   : > { %s538_s4 = scalar_lea.hbm %s896_s0, 256  ;;  %p539_p9 = scmp.lt.u32.totalorder %s789_s9, %s896_s0 }
  0x39   : > { %p536_p5 = pnand %p535_p3, %p534_p0  ;;  %p540_p1 = scmp.lt.u32.totalorder %s538_s4, %s533_s19 }
  0x3a   : > { %p542_p4 = scmp.lt.u32.totalorder %s533_s19, %s789_s9 }
  0x3b   : > { %p537_p7 = pneg %p536_p5  ;;  %p541_p2 = por %p540_p1, %p539_p9 }
  0x3d   : > { %p543_p6 = por %p542_p4, %p541_p2 }
  0x3f   : > { %p544_p8 = pnand %p543_p6, %p537_p7 }
  0x41   : > { %547 = shalt.err (!%p544_p8)
}
  0x42   : > { %s548_s26 = scalar_lea.vmem %s791_s10, 128  ;;  %s654_s7 = smov [#allocation2]  }
  0x43   : > { %p549_p12 = scmp.ne.s32.totalorder %s791_s10, %s548_s26  ;;  %s553_s8 = sshll.u32 %s654_s7, 4  ;;  %s554_s8 = int_to_ptr.vmem [resolvable:$false] %s553_s8 }
  0x44   : > { %s555_s21 = scalar_lea.vmem %s554_s8, 256  ;;  %p556_p5 = scmp.lt.s32.totalorder %s791_s10, %s554_s8 }
  0x45   : > { %p551_p11 = pnand %p549_p12, %p535_p3  ;;  %p557_p9 = scmp.lt.s32.totalorder %s555_s21, %s548_s26 }
  0x47   : > { %p552_p0 = pneg %p551_p11  ;;  %p558_p1 = por %p557_p9, %p556_p5 }
  0x49   : > { %p559_p2 = pnand %p558_p1, %p552_p0 }
  0x4b   : > { %562 = shalt.err (!%p559_p2)
}
  0x4c   : > { %441 = dma.hbm_to_vmem [thread:$0]  (!%p795_p13), %s789_s9, 128, %s791_s10, %s165_s18  }
  0x4d   : > { %p914_p7 = scmp.ne.s32.totalorder %s908_s24, 0 }
  0x4e   : > { %s827_s19 = sand.u32 (!%p914_p7), 1, %s633_s13   ;;  %p915_p3 = scmp.ne.s32.totalorder (!%p914_p7), %s906_s22, 0 }
  0x4f   : > { %185 = sbr.rel (%p914_p7) target bundleno = 329 (0x149), region = 32  ;;  %s404_s25 = sshll.u32 (!%p914_p7), %s827_s19, 3 }
  0x50   : > { %s188_s27 = scalar_lea.sflag (!%p914_p7), [#allocation3], %s827_s19  ;;  %s191_s4 = scalar_lea.vmem (!%p914_p7), [#allocation2], %s404_s25 }
  0x56   : > { %616 = dma.done.wait (%p915_p3), %s188_s27, 128  }
  0x57   : > { %618 = vsyncadd (%p915_p3), %s188_s27, 4294967168  ;;  %p916_p4 = scmp.ne.s32.totalorder %s904_s20, 0 }
  0x59   : > { %620 = dma.done.wait (%p916_p4), [#allocation6], 256  }
  0x5a   : > { %622 = vsyncadd (%p916_p4), [#allocation6], 4294967040  ;;  %v655_v0 = vmov 0.0   ;;  %vm656_vm0 = vmmov 0   ;;  %v503_v1 = vld [vmem:[#allocation5] sm:$0xff]   ;;  %v504_v2 = vld [vmem:[#allocation5 + $0x8] sm:$0xff]  }
  0x5b   : > { %418 = vmatprep.subr.bf16.mxu0 %v655_v0  ;;  %422 = vmatprep.mubr.msk.bf16.mxu0 %vm656_vm0, %v655_v0  ;;  %v219_v3 = vld [vmem:[%s191_s4] sm:$0xff]  ;;  %vm244_vm1 = vcmask 261120   ;;  %s406_s22 = sshll.u32 %s827_s19, 2  ;;  %s412_s9 = sshll.u32 %s641_s15, 6  ;;  %vm289_vm2 = vcmask 519168  }
  0x5c   : > { %419 = vmatpush3.bf16.msra.mxu0 %v503_v1  ;;  %v220_v4 = vpack.c.bf16 %v219_v3, %v219_v3  ;;  %v407_v5 = vld [vmem:[%s898_s2] ss:$0 sm:$0xff]  ;;  %s217_s10 = scalar_lea.vmem [#allocation7], %s406_s22  ;;  %s847_s6 = scalar_lea.hbm %s899_s3, %s412_s9 }
  0x5d   : > { %420 = vmatprep.subr.bf16.mxu0 %v655_v0  ;;  %s306_s11 = sshll.u32 %s217_s10, 4  ;;  %s292_s15 = scalar_lea.sflag [#allocation4], %s827_s19  ;;  %s849_s11 = int_to_ptr.vmem [resolvable:$true] %s306_s11 }
  0x5e   : > { %s563_s26 = scalar_lea.vmem %s849_s11, 64  ;;  %s657_s7 = smov [#allocation7]  }
  0x5f   : > { %p564_p13 = scmp.ne.s32.totalorder %s849_s11, %s563_s26  ;;  %s567_s8 = sshll.u32 %s657_s7, 4  ;;  %s568_s8 = int_to_ptr.vmem [resolvable:$false] %s567_s8 }
  0x60   : > { %421 = vmatpush3.bf16.msra.mxu0 %v504_v2  ;;  %s569_s21 = scalar_lea.vmem %s568_s8, 128  ;;  %p570_p12 = scmp.lt.s32.totalorder %s849_s11, %s568_s8 }
  0x61   : > { %p565_p6 = pnand %p564_p13, %p774_p10  ;;  %p571_p11 = scmp.lt.s32.totalorder %s569_s21, %s563_s26 }
  0x63   : > { %423 = vmatmul.mubr.msk.bf16.vlgmr.msra.gmra.mrb[0].mxu0 %vm244_vm1, %v220_v4  ;;  %p566_p8 = pneg %p565_p6  ;;  %p572_p0 = por %p571_p11, %p570_p12 }
  0x65   : > { %p573_p5 = pnand %p572_p0, %p566_p8 }
 0x136   : > { %v282_v6 = vpop.f32.mrb[0].mxu0 }
 0x137   : > { %v283_v7 = vadd.f32 %v407_v5, %v282_v6  ;;  %v424_v8 = vpop.f32.mrb[1].mxu0 }
 0x138   : > { %v285_v9 = vpop.f32.mrb[2].mxu0 }
 0x139   : > { %v288_v10 = vpack.c.bf16 %v283_v7, %v283_v7  ;;  %v425_v11 = vpop.f32.mrb[3].mxu0 }
 0x13b   : > { %290 = vst.msk [vmem:[%s217_s10] sm:$0xf] %vm289_vm2, %v288_v10 }
 0x13c   : > { %576 = shalt.err (!%p573_p5)
}
 0x13d   : > { %s577_s19 = scalar_lea.hbm %s847_s6, 64  ;;  %s581_s4 = scalar_lea.hbm %s899_s3, 128 }
 0x13e   : > { %p578_p9 = scmp.ne.s32.totalorder %s847_s6, %s577_s19  ;;  %p582_p7 = scmp.lt.u32.totalorder %s847_s6, %s899_s3 }
 0x13f   : > { %p583_p3 = scmp.lt.u32.totalorder %s581_s4, %s577_s19  ;;  %p585_p13 = scmp.lt.u32.totalorder %s577_s19, %s847_s6 }
 0x140   : > { %p579_p1 = pnand %p578_p9, %p774_p10 }
 0x141   : > { %p584_p4 = por %p583_p3, %p582_p7 }
 0x142   : > { %p580_p2 = pneg %p579_p1 }
 0x143   : > { %p586_p6 = por %p585_p13, %p584_p4 }
 0x145   : > { %p587_p8 = pnand %p586_p6, %p580_p2 }
 0x147   : > { %590 = shalt.err (!%p587_p8)
}
 0x148   : > { %432 = dma.vmem_to_hbm [thread:$0]  (%p774_p10), %s849_s11, 64, %s847_s6, %s292_s15  }
 0x149 PF: > { %s318_s20 = sand.u32 1, %s629_s12   ;;  %p917_p12 = scmp.ne.s32.totalorder %s907_s23, 0 }
 0x14a   : > { %p918_p11 = scmp.ge.s32.totalorder %s649_s17, 2  ;;  %s319_s9 = scalar_lea.sflag [#allocation4], %s318_s20 }
 0x14c   : > { %p443_p0 = pnand %p918_p11, %p917_p12 }
 0x14e   : > { %624 = dma.done.wait (!%p443_p0), %s319_s9, 64  }
 0x14f   : > { %626 = vsyncadd (!%p443_p0), %s319_s9, 4294967232  ;;  %s20_s17 = sadd.s32 1, %s649_s17   ;;  %s919_s12 = smov %s633_s13 }
 0x150   : > { %p17_p5 = scmp.ge.s32.totalorder %s20_s17, 4   ;;  %s920_s13 = smov %s637_s14 }
 0x151   : > { %s921_s14 = smov %s783_s5  ;;  %s922_s15 = smov %s645_s16 }
 0x152   : > { %s923_s16 = smov %s925_s28  ;;  %19 = sbr.rel (!%p17_p5) target bundleno = 7 (0x7), region = 81 }
 0x159   :  { %324 = vsyncpa [#allocation3], 1 }
 0x15a   :  { %326 = vsyncpa [#allocation3 + $0x1], 1 }
 0x15b   :  { %327 = vsyncpa [#allocation6], 1 }
 0x15c   :  { %328 = vsyncpa [#allocation4], 1 }
 0x15d   :  { %330 = vsyncpa [#allocation4 + $0x1], 1 }

</bundles_post_ra>
